<compile_context>
chip_gen: v7x
topology: tpu7x:2x2x1
jax: 0.10.0
libtpu: 0.0.40
codegen_flags: <defaults>
</compile_context>

<pallas_src>
import functools

import jax
import jax.numpy as jnp
from jax import lax
from jax.experimental import pallas as pl
from jax.experimental.pallas import tpu as pltpu

LANE = 128           # pad all feature dims to a multiple of the TPU lane width
MAX_ROW_TILE = 256   # batch tile: matches 2x256 MXU height on v6e/v7x


def _round_up(n, m):
    return ((n + m - 1) // m) * m


def _leaky_relu_05(x):
    # LeakyReLU(negative_slope=0.5)
    return jnp.where(x >= 0, x, 0.5 * x)


# ----------------------------- shared kernel body ------------------------------
def _mlp_logits(x_ref, w1_ref, b1_ref, w2_ref, b2_ref, w3_ref, b3_ref,
                w4_ref, b4_ref):
    """4-layer MLP body.  Weights are (in_pad, out_pad) in the MXU compute dtype
    (f32 or bf16); accumulation and activations are f32."""
    w1 = w1_ref[...]
    cd = w1.dtype  # MXU compute dtype; x was pre-cast in the wrapper

    h = jnp.dot(x_ref[...], w1, preferred_element_type=jnp.float32) + b1_ref[...]
    h = _leaky_relu_05(h)

    h = jnp.dot(h.astype(cd), w2_ref[...],
                preferred_element_type=jnp.float32) + b2_ref[...]
    h = _leaky_relu_05(h)

    h = jnp.dot(h.astype(cd), w3_ref[...],
                preferred_element_type=jnp.float32) + b3_ref[...]
    h = _leaky_relu_05(h)

    logits = jnp.dot(h.astype(cd), w4_ref[...],
                     preferred_element_type=jnp.float32) + b4_ref[...]
    return logits


def _softmax_dim0(logits, valid_rows):
    """Softmax over dim 0 (batch).  Rows >= valid_rows (zero padding added by
    the wrapper) are masked to -inf so they contribute 0 to the column sums.
    valid_rows is a static Python int -> the mask is a compile-time constant."""
    row_ids = lax.broadcasted_iota(jnp.int32, logits.shape, 0)
    masked = jnp.where(row_ids < valid_rows, logits, -jnp.inf)
    m = jnp.max(masked, axis=0, keepdims=True)
    e = jnp.exp(masked - m)
    s = jnp.sum(e, axis=0, keepdims=True)
    return e * pl.reciprocal(s, approx=True)


# ------------------- Kernel A: fully fused MLP + dim-0 softmax -----------------
def mlp_softmax_fused_kernel(valid_rows,
                             x_ref,
                             w1_ref, b1_ref, w2_ref, b2_ref,
                             w3_ref, b3_ref, w4_ref, b4_ref,
                             o_ref):
    logits = _mlp_logits(x_ref, w1_ref, b1_ref, w2_ref, b2_ref,
                         w3_ref, b3_ref, w4_ref, b4_ref)
    o_ref[...] = _softmax_dim0(logits, valid_rows).astype(o_ref.dtype)


# ----------------------- Kernel B1: batch-tiled MLP only -----------------------
def mlp_kernel(x_ref,
               w1_ref, b1_ref, w2_ref, b2_ref,
               w3_ref, b3_ref, w4_ref, b4_ref,
               o_ref):
    logits = _mlp_logits(x_ref, w1_ref, b1_ref, w2_ref, b2_ref,
                         w3_ref, b3_ref, w4_ref, b4_ref)
    o_ref[...] = logits.astype(o_ref.dtype)   # 128-wide lane-dense store


# --------------- Kernel B2: column-tiled softmax over dim 0 (batch) ------------
def softmax_dim0_kernel(valid_rows, logits_ref, o_ref):
    o_ref[...] = _softmax_dim0(logits_ref[...], valid_rows).astype(o_ref.dtype)


# ---------------------------------- Wrapper ------------------------------------
def prepack_params(params, compute_dtype=jnp.float32):
    """One-time parameter packing (do NOT call per forward):
    PyTorch (out, in) weights -> (in_pad, out_pad) with both dims padded to 128,
    cast to compute_dtype (f32, or bf16 for v6e/v7x MXU).  Biases stay f32 as
    (1, out_pad).  Zero padding is exact: padded activations stay 0 through
    LeakyReLU and padded weight rows contribute nothing."""
    packed = []
    for W, b in params:
        out_d, in_d = W.shape
        in_p, out_p = _round_up(in_d, LANE), _round_up(out_d, LANE)
        Wt = jnp.zeros((in_p, out_p), compute_dtype)
        Wt = Wt.at[:in_d, :out_d].set(jnp.asarray(W, compute_dtype).T)
        bp = jnp.zeros((1, out_p), jnp.float32)
        bp = bp.at[:, :out_d].set(jnp.asarray(b, jnp.float32).reshape(1, -1))
        packed.append((Wt, bp))
    return packed


@functools.partial(jax.jit, static_argnames=("out_size",))
def fully_connected_forward(x, packed_params, *, out_size):
    """x: (B, input_size) float32.  packed_params: output of prepack_params.
    Returns (B, out_size) float32, softmax'ed over dim 0 (batch)."""
    B, in_size = x.shape
    (w1, b1), (w2, b2), (w3, b3), (w4, b4) = packed_params
    in_pad = w1.shape[0]
    out_pad = w4.shape[1]
    compute_dtype = w1.dtype

    # Row tile: multiple of 8 (sublane), capped at MAX_ROW_TILE; pad batch to it.
    tb = MAX_ROW_TILE if B >= MAX_ROW_TILE else _round_up(B, 8)
    b_pad = _round_up(B, tb)

    xp = jnp.zeros((b_pad, in_pad), compute_dtype)
    xp = xp.at[:B, :in_size].set(x.astype(compute_dtype))

    vmem = pl.BlockSpec(memory_space=pltpu.MemorySpace.VMEM)
    weights = (w1, b1, w2, b2, w3, b3, w4, b4)

    if b_pad == tb:
        # ---- fast path: one fused kernel, softmax included ----
        probs_pad = pl.pallas_call(
            functools.partial(mlp_softmax_fused_kernel, B),
            out_shape=jax.ShapeDtypeStruct((b_pad, out_pad), jnp.float32),
            in_specs=[vmem] * 9,
            out_specs=vmem,
        )(xp, *weights)
        return probs_pad[:B, :out_size]

    # ---- large-batch path: batch-tiled MLP, then column-tiled softmax ----
    def resident(arr):  # full array resident in VMEM across the batch grid
        return pl.BlockSpec(arr.shape, lambda i: (0, 0))

    logits_pad = pl.pallas_call(
        mlp_kernel,
        out_shape=jax.ShapeDtypeStruct((b_pad, out_pad), jnp.float32),
        grid=(b_pad // tb,),
        in_specs=[pl.BlockSpec((tb, in_pad), lambda i: (i, 0))]
                 + [resident(a) for a in weights],
        out_specs=pl.BlockSpec((tb, out_pad), lambda i: (i, 0)),
        compiler_params=pltpu.CompilerParams(
            dimension_semantics=("parallel",)),
    )(xp, *weights)

    # Columns are independent under dim-0 softmax, so tile the lane axis.
    # Padded batch rows are masked inside the kernel (no XLA slice in between);
    # padded logit columns are harmless and sliced off at the very end.
    probs_pad = pl.pallas_call(
        functools.partial(softmax_dim0_kernel, B),
        out_shape=jax.ShapeDtypeStruct((b_pad, out_pad), jnp.float32),
        grid=(out_pad // LANE,),
        in_specs=[pl.BlockSpec((b_pad, LANE), lambda j: (0, j))],
        out_specs=pl.BlockSpec((b_pad, LANE), lambda j: (0, j)),
        compiler_params=pltpu.CompilerParams(
            dimension_semantics=("parallel",)),
    )(logits_pad)

    return probs_pad[:B, :out_size]


# ---------------------------- Reference / test glue -----------------------------
def init_params(key, input_size, output_size, architecture=(512, 32, 16)):
    """PyTorch-style nn.Linear init: U(-1/sqrt(fan_in), 1/sqrt(fan_in))."""
    sizes = [input_size] + list(architecture) + [output_size]
    params = []
    for i in range(len(sizes) - 1):
        fan_in, fan_out = sizes[i], sizes[i + 1]
        key, kw, kb = jax.random.split(key, 3)
        bound = 1.0 / (fan_in ** 0.5)
        W = jax.random.uniform(kw, (fan_out, fan_in), jnp.float32, -bound, bound)
        b = jax.random.uniform(kb, (fan_out,), jnp.float32, -bound, bound)
        params.append((W, b))
    return params


def reference_forward(x, params):
    h = x
    for i, (W, b) in enumerate(params):
        h = h @ W.T + b
        if i < len(params) - 1:
            h = jnp.where(h >= 0, h, 0.5 * h)
    return jax.nn.softmax(h, axis=0)


if __name__ == "__main__":
    key = jax.random.PRNGKey(0)
    batch, input_size, output_size = 8, 32, 10

    kx, kp, kx2 = jax.random.split(key, 3)
    x = jax.random.normal(kx, (batch, input_size), jnp.float32)
    params = init_params(kp, input_size, output_size)
    ref = reference_forward(x, params)

    # f32 compute path (all generations) -- fused single-kernel fast path
    packed_f32 = prepack_params(params, jnp.float32)
    out = jax.block_until_ready(
        fully_connected_forward(x, packed_f32, out_size=output_size))
    assert out.shape == (batch, output_size)
    assert jnp.allclose(out, ref, atol=2e-3, rtol=2e-3), "f32 mismatch vs reference"

    # bf16 MXU path (recommended on v6e/v7x); same semantics, looser tolerance
    packed_bf16 = prepack_params(params, jnp.bfloat16)
    out_bf16 = jax.block_until_ready(
        fully_connected_forward(x, packed_bf16, out_size=output_size))
    assert out_bf16.shape == (batch, output_size)
    assert jnp.allclose(out_bf16, ref, atol=5e-2, rtol=5e-2), "bf16 mismatch vs reference"

    # Large-batch path (batch-tiled MLP + column-tiled softmax), f32
    big_batch = 384  # > MAX_ROW_TILE and not a multiple of the 256-row tile
    xb = jax.random.normal(kx2, (big_batch, input_size), jnp.float32)
    ref_b = reference_forward(xb, params)
    out_b = jax.block_until_ready(
        fully_connected_forward(xb, packed_f32, out_size=output_size))
    assert out_b.shape == (big_batch, output_size)
    assert jnp.allclose(out_b, ref_b, atol=2e-3, rtol=2e-3), "tiled-path mismatch"

    # TODO(synk): training loop / optimizer / loss from the PyTorch module are out
    # of scope; only the forward pass is implemented.
    print("KERNEL_OK")
</pallas_src>

<mosaic_0001>
module attributes {stable_mosaic.version = 11 : i64} {
  func.func @mlp_softmax_fused_kernel(%arg0: memref<8x128xf32, #tpu.memory_space<vmem>>, %arg1: memref<128x512xf32, #tpu.memory_space<vmem>>, %arg2: memref<1x512xf32, #tpu.memory_space<vmem>>, %arg3: memref<512x128xf32, #tpu.memory_space<vmem>>, %arg4: memref<1x128xf32, #tpu.memory_space<vmem>>, %arg5: memref<128x128xf32, #tpu.memory_space<vmem>>, %arg6: memref<1x128xf32, #tpu.memory_space<vmem>>, %arg7: memref<128x128xf32, #tpu.memory_space<vmem>>, %arg8: memref<1x128xf32, #tpu.memory_space<vmem>>, %arg9: memref<8x128xf32, #tpu.memory_space<vmem>>) attributes {dimension_semantics = [], scalar_prefetch = 0 : i64, scratch_operands = 0 : i64, tpu.core_type = #tpu.core_type<tc>} {
    %c0 = arith.constant 0 : index
    %c0_0 = arith.constant 0 : index
    %0 = vector.load %arg1[%c0, %c0_0] : memref<128x512xf32, #tpu.memory_space<vmem>>, vector<128x512xf32>
    %c0_1 = arith.constant 0 : index
    %c0_2 = arith.constant 0 : index
    %1 = vector.load %arg0[%c0_1, %c0_2] : memref<8x128xf32, #tpu.memory_space<vmem>>, vector<8x128xf32>
    %cst = arith.constant dense<0.000000e+00> : vector<8x512xf32>
    %2 = tpu.matmul %1, %0, %cst {dimension_numbers = #tpu.dot_dimension_numbers<[1], [0], [0], [1], [0, 0, 1, 1], [], []>} : vector<8x128xf32>, vector<128x512xf32>, vector<8x512xf32> -> vector<8x512xf32>
    %c0_3 = arith.constant 0 : index
    %c0_4 = arith.constant 0 : index
    %3 = vector.load %arg2[%c0_3, %c0_4] : memref<1x512xf32, #tpu.memory_space<vmem>>, vector<1x512xf32>
    %4 = vector.broadcast %3 : vector<1x512xf32> to vector<8x512xf32>
    %5 = arith.addf %2, %4 : vector<8x512xf32>
    %cst_5 = arith.constant 0.000000e+00 : f32
    %6 = vector.broadcast %cst_5 : f32 to vector<8x512xf32>
    %7 = arith.cmpf oge, %5, %6 : vector<8x512xf32>
    %cst_6 = arith.constant 5.000000e-01 : f32
    %8 = vector.broadcast %cst_6 : f32 to vector<8x512xf32>
    %9 = arith.mulf %8, %5 : vector<8x512xf32>
    %10 = arith.select %7, %5, %9 : vector<8x512xi1>, vector<8x512xf32>
    %c0_7 = arith.constant 0 : index
    %c0_8 = arith.constant 0 : index
    %11 = vector.load %arg3[%c0_7, %c0_8] : memref<512x128xf32, #tpu.memory_space<vmem>>, vector<512x128xf32>
    %cst_9 = arith.constant dense<0.000000e+00> : vector<8x128xf32>
    %12 = tpu.matmul %10, %11, %cst_9 {dimension_numbers = #tpu.dot_dimension_numbers<[1], [0], [0], [1], [0, 0, 1, 1], [], []>} : vector<8x512xf32>, vector<512x128xf32>, vector<8x128xf32> -> vector<8x128xf32>
    %c0_10 = arith.constant 0 : index
    %c0_11 = arith.constant 0 : index
    %13 = vector.load %arg4[%c0_10, %c0_11] : memref<1x128xf32, #tpu.memory_space<vmem>>, vector<1x128xf32>
    %14 = vector.broadcast %13 : vector<1x128xf32> to vector<8x128xf32>
    %15 = arith.addf %12, %14 : vector<8x128xf32>
    %cst_12 = arith.constant 0.000000e+00 : f32
    %16 = vector.broadcast %cst_12 : f32 to vector<8x128xf32>
    %17 = arith.cmpf oge, %15, %16 : vector<8x128xf32>
    %cst_13 = arith.constant 5.000000e-01 : f32
    %18 = vector.broadcast %cst_13 : f32 to vector<8x128xf32>
    %19 = arith.mulf %18, %15 : vector<8x128xf32>
    %20 = arith.select %17, %15, %19 : vector<8x128xi1>, vector<8x128xf32>
    %c0_14 = arith.constant 0 : index
    %c0_15 = arith.constant 0 : index
    %21 = vector.load %arg5[%c0_14, %c0_15] : memref<128x128xf32, #tpu.memory_space<vmem>>, vector<128x128xf32>
    %cst_16 = arith.constant dense<0.000000e+00> : vector<8x128xf32>
    %22 = tpu.matmul %20, %21, %cst_16 {dimension_numbers = #tpu.dot_dimension_numbers<[1], [0], [0], [1], [0, 0, 1, 1], [], []>} : vector<8x128xf32>, vector<128x128xf32>, vector<8x128xf32> -> vector<8x128xf32>
    %c0_17 = arith.constant 0 : index
    %c0_18 = arith.constant 0 : index
    %23 = vector.load %arg6[%c0_17, %c0_18] : memref<1x128xf32, #tpu.memory_space<vmem>>, vector<1x128xf32>
    %24 = vector.broadcast %23 : vector<1x128xf32> to vector<8x128xf32>
    %25 = arith.addf %22, %24 : vector<8x128xf32>
    %cst_19 = arith.constant 0.000000e+00 : f32
    %26 = vector.broadcast %cst_19 : f32 to vector<8x128xf32>
    %27 = arith.cmpf oge, %25, %26 : vector<8x128xf32>
    %cst_20 = arith.constant 5.000000e-01 : f32
    %28 = vector.broadcast %cst_20 : f32 to vector<8x128xf32>
    %29 = arith.mulf %28, %25 : vector<8x128xf32>
    %30 = arith.select %27, %25, %29 : vector<8x128xi1>, vector<8x128xf32>
    %c0_21 = arith.constant 0 : index
    %c0_22 = arith.constant 0 : index
    %31 = vector.load %arg7[%c0_21, %c0_22] : memref<128x128xf32, #tpu.memory_space<vmem>>, vector<128x128xf32>
    %cst_23 = arith.constant dense<0.000000e+00> : vector<8x128xf32>
    %32 = tpu.matmul %30, %31, %cst_23 {dimension_numbers = #tpu.dot_dimension_numbers<[1], [0], [0], [1], [0, 0, 1, 1], [], []>} : vector<8x128xf32>, vector<128x128xf32>, vector<8x128xf32> -> vector<8x128xf32>
    %c0_24 = arith.constant 0 : index
    %c0_25 = arith.constant 0 : index
    %33 = vector.load %arg8[%c0_24, %c0_25] : memref<1x128xf32, #tpu.memory_space<vmem>>, vector<1x128xf32>
    %34 = vector.broadcast %33 : vector<1x128xf32> to vector<8x128xf32>
    %35 = arith.addf %32, %34 : vector<8x128xf32>
    %36 = tpu.iota {dimensions = array<i32: 0>} : vector<8x128xi32>
    %c8_i32 = arith.constant 8 : i32
    %37 = vector.broadcast %c8_i32 : i32 to vector<8x128xi32>
    %38 = arith.cmpi slt, %36, %37 : vector<8x128xi32>
    %cst_26 = arith.constant 0xFF800000 : f32
    %39 = vector.broadcast %cst_26 : f32 to vector<8x128xf32>
    %40 = arith.select %38, %35, %39 : vector<8x128xi1>, vector<8x128xf32>
    %cst_27 = arith.constant dense<0xFF800000> : vector<128xf32>
    %41 = vector.multi_reduction <maximumf>, %40, %cst_27 [0] : vector<8x128xf32> to vector<128xf32>
    %42 = vector.shape_cast %41 : vector<128xf32> to vector<1x128xf32>
    %43 = vector.broadcast %42 : vector<1x128xf32> to vector<8x128xf32>
    %44 = arith.subf %40, %43 : vector<8x128xf32>
    %45 = math.exp %44 : vector<8x128xf32>
    %cst_28 = arith.constant dense<0.000000e+00> : vector<128xf32>
    %46 = vector.multi_reduction <add>, %45, %cst_28 [0] : vector<8x128xf32> to vector<128xf32>
    %47 = vector.shape_cast %46 : vector<128xf32> to vector<1x128xf32>
    %48 = tpu.reciprocal %47 {approx = true} : vector<1x128xf32> -> vector<1x128xf32>
    %49 = vector.broadcast %48 : vector<1x128xf32> to vector<8x128xf32>
    %50 = arith.mulf %45, %49 : vector<8x128xf32>
    %c0_29 = arith.constant 0 : index
    %c0_30 = arith.constant 0 : index
    %51 = vector.load %arg9[%c0_29, %c0_30] : memref<8x128xf32, #tpu.memory_space<vmem>>, vector<8x128xf32>
    tpu.vector_store %arg9[%c0_29, %c0_30], %50 {strides = array<i32>} : memref<8x128xf32, #tpu.memory_space<vmem>>, vector<8x128xf32>,
    return
  }
}

</mosaic_0001>

<bundles_post_ra>
// kernel: fully_connected_forward.1
= control target key start
LH: loop header
LB: loop body
LE: loop exit
PB: predicated region body
PF: predicated region fallthrough
CT: control target
= control target key end

     0   :  { %14 = vsyncpa [#allocation3], 0  ;;  %s1431_s0 = inlined_call_operand.vmem [shape: f32[8,128], index: 0, kind: input, shape index: {}]   ;;  %s1432_s1 = inlined_call_operand.hbm [shape: f32[128,512], index: 1, kind: input, shape index: {}]   ;;  %s1433_s2 = inlined_call_operand.vmem [shape: f32[1,512], index: 2, kind: input, shape index: {}]   ;;  %s1434_s3 = inlined_call_operand.hbm [shape: f32[512,128], index: 3, kind: input, shape index: {}]   ;;  %s1435_s4 = inlined_call_operand.vmem [shape: f32[1,128], index: 4, kind: input, shape index: {}]   ;;  %s1436_s5 = inlined_call_operand.hbm [shape: f32[128,128], index: 5, kind: input, shape index: {}]   ;;  %s1437_s6 = inlined_call_operand.vmem [shape: f32[1,128], index: 6, kind: input, shape index: {}]   ;;  %s1438_s7 = inlined_call_operand.hbm [shape: f32[128,128], index: 7, kind: input, shape index: {}]   ;;  %s1439_s8 = inlined_call_operand.vmem [shape: f32[1,128], index: 8, kind: input, shape index: {}]   ;;  %s1440_s9 = inlined_call_operand.hbm [shape: f32[8,128], index: 9, kind: output, shape index: {}]  }
   0x1   :  { %15 = vsyncpa [#allocation6], 0 }
   0x2   :  { %16 = vsyncpa [#allocation9], 0 }
   0x3   :  { %17 = vsyncpa [#allocation4], 0  ;;  %s1258_s30 = smov [#allocation5]   ;;  %s1140_s13 = scalar_lea.hbm %s1434_s3, 8192 }
   0x4   :  { %s39_s10 = sshll.u32 %s1258_s30, 4  ;;  %p1141_p0 = scmp.ne.s32.totalorder %s1434_s3, %s1140_s13  ;;  %s40_s10 = int_to_ptr.vmem [resolvable:$true] %s39_s10 }
   0x5   :  { %p1144_p1 = scmp.lt.u32.totalorder %s1140_s13, %s1434_s3 }
   0x7   :  { %p1146_p2 = pnand %p1144_p1, %p1141_p0 }
   0x9   :  { %1149 = shalt.err (!%p1146_p2)
}
   0xa   :  { %s1150_s18 = scalar_lea.vmem %s40_s10, 8192  ;;  %p1155_p4 = scmp.lt.s32.totalorder %s40_s10, %s40_s10 }
   0xb   :  { %p1151_p3 = scmp.ne.s32.totalorder %s40_s10, %s1150_s18  ;;  %p1156_p5 = scmp.lt.s32.totalorder %s1150_s18, %s1150_s18 }
   0xd   :  { %p1157_p6 = por %p1156_p5, %p1155_p4 }
   0xf   :  { %p1158_p7 = pnand %p1157_p6, %p1151_p3 }
  0x11   :  { %1161 = shalt.err (!%p1158_p7)
}
  0x12   :  { %s1259_s19 = smov 128   ;;  %s1260_s20 = smov 8  }
  0x13   :  { %45 = dma.hbm_to_vmem [thread:$0]  %s1434_s3, 8192, %s40_s10, [#allocation6], %s1259_s19, %s1259_s19, %s1260_s20  }
  0x14   :  { %s1261_s23 = smov [#allocation2]   ;;  %s1162_s27 = scalar_lea.hbm %s1432_s1, 8192 }
  0x15   :  { %s25_s24 = sshll.u32 %s1261_s23, 4  ;;  %p1163_p8 = scmp.ne.s32.totalorder %s1432_s1, %s1162_s27  ;;  %s26_s24 = int_to_ptr.vmem [resolvable:$true] %s25_s24 }
  0x16   :  { %p1166_p9 = scmp.lt.u32.totalorder %s1162_s27, %s1432_s1 }
  0x18   :  { %p1168_p10 = pnand %p1166_p9, %p1163_p8 }
  0x1a   :  { %1171 = shalt.err (!%p1168_p10)
}
  0x1b   :  { %s1172_s12 = scalar_lea.vmem %s26_s24, 8192  ;;  %p1177_p12 = scmp.lt.s32.totalorder %s26_s24, %s26_s24 }
  0x1c   :  { %p1173_p11 = scmp.ne.s32.totalorder %s26_s24, %s1172_s12  ;;  %p1178_p13 = scmp.lt.s32.totalorder %s1172_s12, %s1172_s12 }
  0x1e   :  { %p1179_p0 = por %p1178_p13, %p1177_p12 }
  0x20   :  { %p1180_p1 = pnand %p1179_p0, %p1173_p11 }
  0x22   :  { %1183 = shalt.err (!%p1180_p1)
}
  0x23   :  { %s1262_s3 = smov 512   ;;  %s1263_s10 = smov 32  }
  0x24   :  { %31 = dma.hbm_to_vmem [thread:$0]  %s1432_s1, 8192, %s26_s24, [#allocation3], %s1262_s3, %s1262_s3, %s1263_s10  }
  0x25   :  { %s1264_s15 = smov [#allocation7]   ;;  %s1265_s17 = smov [#allocation8]  }
  0x26   :  { %s53_s16 = sshll.u32 %s1264_s15, 4  ;;  %s67_s18 = sshll.u32 %s1265_s17, 4  ;;  %s54_s16 = int_to_ptr.vmem [resolvable:$true] %s53_s16  ;;  %s1347_s18 = int_to_ptr.vmem [resolvable:$true] %s67_s18 }
  0x27   :  { %s1184_s23 = scalar_lea.hbm %s1436_s5, 2048 }
  0x28   :  { %p1185_p2 = scmp.ne.s32.totalorder %s1436_s5, %s1184_s23  ;;  %p1188_p3 = scmp.lt.u32.totalorder %s1184_s23, %s1436_s5 }
  0x2a   :  { %p1190_p4 = pnand %p1188_p3, %p1185_p2 }
  0x2c   :  { %1193 = shalt.err (!%p1190_p4)
}
  0x2d   :  { %s1194_s1 = scalar_lea.vmem %s54_s16, 2048  ;;  %p1199_p6 = scmp.lt.s32.totalorder %s54_s16, %s54_s16 }
  0x2e   :  { %p1195_p5 = scmp.ne.s32.totalorder %s54_s16, %s1194_s1  ;;  %p1200_p7 = scmp.lt.s32.totalorder %s1194_s1, %s1194_s1 }
  0x30   :  { %p1201_p8 = por %p1200_p7, %p1199_p6 }
  0x32   :  { %p1202_p9 = pnand %p1201_p8, %p1195_p5 }
  0x34   :  { %1205 = shalt.err (!%p1202_p9)
}
  0x35   :  { %59 = dma.hbm_to_vmem [thread:$0]  %s1436_s5, 2048, %s54_s16, [#allocation6], %s1259_s19, %s1259_s19, %s1260_s20  }
  0x36   :  { %s1206_s12 = scalar_lea.hbm %s1438_s7, 2048 }
  0x37   :  { %p1207_p10 = scmp.ne.s32.totalorder %s1438_s7, %s1206_s12  ;;  %p1210_p11 = scmp.lt.u32.totalorder %s1206_s12, %s1438_s7 }
  0x39   :  { %p1212_p12 = pnand %p1210_p11, %p1207_p10 }
  0x3b   :  { %1215 = shalt.err (!%p1212_p12)
}
  0x3c   :  { %s1216_s15 = scalar_lea.vmem %s1347_s18, 2048  ;;  %p1221_p0 = scmp.lt.s32.totalorder %s1347_s18, %s1347_s18 }
  0x3d   :  { %p1217_p13 = scmp.ne.s32.totalorder %s1347_s18, %s1216_s15  ;;  %p1222_p1 = scmp.lt.s32.totalorder %s1216_s15, %s1216_s15 }
  0x3f   :  { %p1223_p2 = por %p1222_p1, %p1221_p0 }
  0x41   :  { %p1224_p3 = pnand %p1223_p2, %p1217_p13 }
  0x43   :  { %1227 = shalt.err (!%p1224_p3)
}
  0x44   :  { %73 = dma.hbm_to_vmem [thread:$0]  %s1438_s7, 2048, %s1347_s18, [#allocation9], %s1259_s19, %s1259_s19, %s1260_s20  }
  0x45   :  { %1250 = dma.done.wait [#allocation3], 8192  }
  0x46   :  { %1251 = vsyncadd [#allocation3], 4294959104 }
  0x47   :  { %1252 = dma.done.wait [#allocation6], 10240  }
  0x48   :  { %1253 = vsyncadd [#allocation6], 4294957056 }
  0x49   :  { %1254 = dma.done.wait [#allocation9], 2048  }
  0x4a   :  { %1255 = vsyncadd [#allocation9], 4294965248  ;;  %v1266_v0 = vmov 0.0   ;;  %v89_v1 = vld [vmem:[#allocation2 + $0x8] sm:$0xff]  ;;  %v91_v3 = vld [vmem:[#allocation2 + $0x18] sm:$0xff]  ;;  %vm1268_vm4 = vmmov 0  }
  0x4b   :  { %239 = vmatprep.mubr.f32.mxu0 %v1266_v0  ;;  %310 = vmatprep.mubr.f32.mxu1 %v1266_v0  ;;  %v93_v2 = vld [vmem:[#allocation2 + $0x28] sm:$0xff]  ;;  %v95_v5 = vld [vmem:[#allocation2 + $0x38] sm:$0xff]  ;;  %v88_v6 = vld [vmem:[#allocation2] sm:$0xff] }
  0x4c   :  { %v948_v4 = vpack.c.bf16 %v93_v2, %v89_v1  ;;  %v92_v7 = vld [vmem:[#allocation2 + $0x20] sm:$0xff]  ;;  %v980_v8 = vpack.c.bf16 %v95_v5, %v91_v3  ;;  %v90_v10 = vld [vmem:[#allocation2 + $0x10] sm:$0xff]  ;;  %v97_v12 = vld [vmem:[#allocation2 + $0x48] sm:$0xff] }
  0x4d   :  { %v950_v9 = vpack.c.bf16 %v92_v7, %v88_v6  ;;  %v94_v11 = vld [vmem:[#allocation2 + $0x30] sm:$0xff]  ;;  %v101_v14 = vld [vmem:[#allocation2 + $0x68] sm:$0xff]  ;;  %v99_v15 = vld [vmem:[#allocation2 + $0x58] sm:$0xff] }
  0x4e   :  { %949 = vmatprep.subr.bf16.mxu0 %v948_v4  ;;  %v982_v13 = vpack.c.bf16 %v94_v11, %v90_v10  ;;  %v103_v16 = vld [vmem:[#allocation2 + $0x78] sm:$0xff]  ;;  %981 = vmatprep.subr.bf16.mxu1 %v980_v8  ;;  %v952_v17 = vpack.c.bf16 %v101_v14, %v97_v12  ;;  %v96_v19 = vld [vmem:[#allocation2 + $0x40] sm:$0xff]  ;;  %v98_v21 = vld [vmem:[#allocation2 + $0x50] sm:$0xff] }
  0x4f   :  { %951 = vmatpush1.bf16.msra.mxu0 %v950_v9  ;;  %v984_v18 = vpack.c.bf16 %v103_v16, %v99_v15  ;;  %v100_v20 = vld [vmem:[#allocation2 + $0x60] sm:$0xff]  ;;  %v102_v23 = vld [vmem:[#allocation2 + $0x70] sm:$0xff]  ;;  %v105_v24 = vld [vmem:[#allocation2 + $0x88] sm:$0xff] }
  0x50   :  { %983 = vmatpush1.bf16.msra.mxu1 %v982_v13  ;;  %v954_v22 = vpack.c.bf16 %v100_v20, %v96_v19  ;;  %v109_v25 = vld [vmem:[#allocation2 + $0xa8] sm:$0xff]  ;;  %953 = vmatprep.subr.bf16.mxu0 %v952_v17  ;;  %v986_v26 = vpack.c.bf16 %v102_v23, %v98_v21  ;;  %v107_v28 = vld [vmem:[#allocation2 + $0x98] sm:$0xff]  ;;  %v104_v30 = vld [vmem:[#allocation2 + $0x80] sm:$0xff] }
  0x51   :  { %985 = vmatprep.subr.bf16.mxu1 %v984_v18  ;;  %v956_v27 = vpack.c.bf16 %v109_v25, %v105_v24  ;;  %v111_v29 = vld [vmem:[#allocation2 + $0xb8] sm:$0xff]  ;;  %v108_v32 = vld [vmem:[#allocation2 + $0xa0] sm:$0xff]  ;;  %v106_v33 = vld [vmem:[#allocation2 + $0x90] sm:$0xff] }
  0x52   :  { %v988_v31 = vpack.c.bf16 %v111_v29, %v107_v28  ;;  %v110_v34 = vld [vmem:[#allocation2 + $0xb0] sm:$0xff]  ;;  %v958_v35 = vpack.c.bf16 %v108_v32, %v104_v30  ;;  %v113_v36 = vld [vmem:[#allocation2 + $0xc8] sm:$0xff]  ;;  %v115_v38 = vld [vmem:[#allocation2 + $0xd8] sm:$0xff] }
  0x53   :  { %955 = vmatpush1.bf16.msra.mxu0 %v954_v22  ;;  %v117_v37 = vld [vmem:[#allocation2 + $0xe8] sm:$0xff]  ;;  %v990_v39 = vpack.c.bf16 %v110_v34, %v106_v33  ;;  %v119_v41 = vld [vmem:[#allocation2 + $0xf8] sm:$0xff]  ;;  %v112_v42 = vld [vmem:[#allocation2 + $0xc0] sm:$0xff] }
  0x54   :  { %987 = vmatpush1.bf16.msra.mxu1 %v986_v26  ;;  %957 = vmatprep.subr.bf16.mxu0 %v956_v27  ;;  %v960_v40 = vpack.c.bf16 %v117_v37, %v113_v36  ;;  %v116_v43 = vld [vmem:[#allocation2 + $0xe0] sm:$0xff]  ;;  %v992_v44 = vpack.c.bf16 %v119_v41, %v115_v38  ;;  %v114_v45 = vld [vmem:[#allocation2 + $0xd0] sm:$0xff]  ;;  %v121_v47 = vld [vmem:[#allocation2 + $0x108] sm:$0xff] }
  0x55   :  { %989 = vmatprep.subr.bf16.mxu1 %v988_v31  ;;  %v118_v46 = vld [vmem:[#allocation2 + $0xf0] sm:$0xff]  ;;  %v125_v48 = vld [vmem:[#allocation2 + $0x128] sm:$0xff]  ;;  %v123_v49 = vld [vmem:[#allocation2 + $0x118] sm:$0xff]  ;;  %v962_v51 = vpack.c.bf16 %v116_v43, %v112_v42 }
  0x56   :  { %v127_v50 = vld [vmem:[#allocation2 + $0x138] sm:$0xff]  ;;  %v994_v52 = vpack.c.bf16 %v118_v46, %v114_v45  ;;  %v964_v53 = vpack.c.bf16 %v125_v48, %v121_v47  ;;  %v120_v54 = vld [vmem:[#allocation2 + $0x100] sm:$0xff]  ;;  %v122_v56 = vld [vmem:[#allocation2 + $0x110] sm:$0xff] }
  0x57   :  { %959 = vmatpush1.bf16.msra.mxu0 %v958_v35  ;;  %v124_v55 = vld [vmem:[#allocation2 + $0x120] sm:$0xff]  ;;  %v996_v57 = vpack.c.bf16 %v127_v50, %v123_v49  ;;  %v126_v58 = vld [vmem:[#allocation2 + $0x130] sm:$0xff]  ;;  %v129_v59 = vld [vmem:[#allocation2 + $0x148] sm:$0xff] }
  0x58   :  { %991 = vmatpush1.bf16.msra.mxu1 %v990_v39  ;;  %961 = vmatprep.subr.bf16.mxu0 %v960_v40  ;;  %v133_v60 = vld [vmem:[#allocation2 + $0x168] sm:$0xff]  ;;  %v131_v61 = vld [vmem:[#allocation2 + $0x158] sm:$0xff]  ;;  %v966_v63 = vpack.c.bf16 %v124_v55, %v120_v54  ;;  %v998_v1 = vpack.c.bf16 %v126_v58, %v122_v56  ;;  %v128_v3 = vld [vmem:[#allocation2 + $0x140] sm:$0xff] }
  0x59   :  { %993 = vmatprep.subr.bf16.mxu1 %v992_v44  ;;  %v135_v62 = vld [vmem:[#allocation2 + $0x178] sm:$0xff]  ;;  %v968_v2 = vpack.c.bf16 %v133_v60, %v129_v59  ;;  %v132_v4 = vld [vmem:[#allocation2 + $0x160] sm:$0xff]  ;;  %v130_v5 = vld [vmem:[#allocation2 + $0x150] sm:$0xff] }
  0x5a   :  { %v1000_v6 = vpack.c.bf16 %v135_v62, %v131_v61  ;;  %v134_v7 = vld [vmem:[#allocation2 + $0x170] sm:$0xff]  ;;  %v137_v8 = vld [vmem:[#allocation2 + $0x188] sm:$0xff]  ;;  %v139_v10 = vld [vmem:[#allocation2 + $0x198] sm:$0xff]  ;;  %v970_v12 = vpack.c.bf16 %v132_v4, %v128_v3 }
  0x5b   :  { %963 = vmatpush1.bf16.msra.mxu0 %v962_v51  ;;  %v141_v9 = vld [vmem:[#allocation2 + $0x1a8] sm:$0xff]  ;;  %v143_v11 = vld [vmem:[#allocation2 + $0x1b8] sm:$0xff]  ;;  %v1002_v13 = vpack.c.bf16 %v134_v7, %v130_v5  ;;  %v136_v15 = vld [vmem:[#allocation2 + $0x180] sm:$0xff] }
  0x5c   :  { %995 = vmatpush1.bf16.msra.mxu1 %v994_v52  ;;  %965 = vmatprep.subr.bf16.mxu0 %v964_v53  ;;  %v972_v14 = vpack.c.bf16 %v141_v9, %v137_v8  ;;  %v140_v16 = vld [vmem:[#allocation2 + $0x1a0] sm:$0xff]  ;;  %v138_v17 = vld [vmem:[#allocation2 + $0x190] sm:$0xff]  ;;  %v1004_v18 = vpack.c.bf16 %v143_v11, %v139_v10  ;;  %v145_v20 = vld [vmem:[#allocation2 + $0x1c8] sm:$0xff] }
  0x5d   :  { %997 = vmatprep.subr.bf16.mxu1 %v996_v57  ;;  %v142_v19 = vld [vmem:[#allocation2 + $0x1b0] sm:$0xff]  ;;  %v149_v21 = vld [vmem:[#allocation2 + $0x1e8] sm:$0xff]  ;;  %v147_v22 = vld [vmem:[#allocation2 + $0x1d8] sm:$0xff]  ;;  %v974_v24 = vpack.c.bf16 %v140_v16, %v136_v15 }
  0x5e   :  { %v151_v23 = vld [vmem:[#allocation2 + $0x1f8] sm:$0xff]  ;;  %v1006_v25 = vpack.c.bf16 %v142_v19, %v138_v17  ;;  %v976_v26 = vpack.c.bf16 %v149_v21, %v145_v20  ;;  %v144_v27 = vld [vmem:[#allocation2 + $0x1c0] sm:$0xff]  ;;  %v146_v29 = vld [vmem:[#allocation2 + $0x1d0] sm:$0xff] }
  0x5f   :  { %967 = vmatpush1.bf16.msra.mxu0 %v966_v63  ;;  %v148_v28 = vld [vmem:[#allocation2 + $0x1e0] sm:$0xff]  ;;  %v1008_v30 = vpack.c.bf16 %v151_v23, %v147_v22  ;;  %v150_v31 = vld [vmem:[#allocation2 + $0x1f0] sm:$0xff]  ;;  %v346_v33 = vld [vmem:[#allocation5 + $0x88] sm:$0xff] }
  0x60   :  { %999 = vmatpush1.bf16.msra.mxu1 %v998_v1  ;;  %969 = vmatprep.subr.bf16.mxu0 %v968_v2  ;;  %v345_v32 = vld [vmem:[#allocation5 + $0x80] sm:$0xff]  ;;  %v378_v35 = vld [vmem:[#allocation5 + $0x188] sm:$0xff]  ;;  %v978_v36 = vpack.c.bf16 %v148_v28, %v144_v27  ;;  %v1010_v37 = vpack.c.bf16 %v150_v31, %v146_v29  ;;  %v347_v44 = vld [vmem:[#allocation5 + $0x90] sm:$0xff] }
  0x61   :  { %1001 = vmatprep.subr.bf16.mxu1 %v1000_v6  ;;  %v377_v34 = vld [vmem:[#allocation5 + $0x180] sm:$0xff]  ;;  %v1012_v38 = vpack.c.bf16 %v346_v33, %v345_v32  ;;  %v330_v40 = vld [vmem:[#allocation5 + $0x8] sm:$0xff]  ;;  %v348_v45 = vld [vmem:[#allocation5 + $0x98] sm:$0xff] }
  0x62   :  { %v329_v39 = vld [vmem:[#allocation5] sm:$0xff]  ;;  %v1044_v42 = vpack.c.bf16 %v378_v35, %v377_v34  ;;  %v362_v43 = vld [vmem:[#allocation5 + $0x108] sm:$0xff]  ;;  %v379_v46 = vld [vmem:[#allocation5 + $0x190] sm:$0xff]  ;;  %v1016_v51 = vpack.c.bf16 %v348_v45, %v347_v44 }
  0x63   :  { %971 = vmatpush1.bf16.msra.mxu0 %v970_v12  ;;  %v361_v41 = vld [vmem:[#allocation5 + $0x100] sm:$0xff]  ;;  %v380_v47 = vld [vmem:[#allocation5 + $0x198] sm:$0xff]  ;;  %v1014_v49 = vpack.c.bf16 %v330_v40, %v329_v39  ;;  %v331_v52 = vld [vmem:[#allocation5 + $0x10] sm:$0xff] }
  0x64   :  { %1003 = vmatpush1.bf16.msra.mxu1 %v1002_v13  ;;  %973 = vmatprep.subr.bf16.mxu0 %v972_v14  ;;  %v152_v48 = vld [vmem:[%s1431_s0] sm:$0xff]  ;;  %v1046_v50 = vpack.c.bf16 %v362_v43, %v361_v41  ;;  %v332_v53 = vld [vmem:[#allocation5 + $0x18] sm:$0xff]  ;;  %v363_v54 = vld [vmem:[#allocation5 + $0x110] sm:$0xff]  ;;  %v1048_v55 = vpack.c.bf16 %v380_v47, %v379_v46 }
  0x65   :  { %1005 = vmatprep.subr.bf16.mxu1 %v1004_v18  ;;  %v364_v56 = vld [vmem:[#allocation5 + $0x118] sm:$0xff]  ;;  %v349_v57 = vld [vmem:[#allocation5 + $0xa0] sm:$0xff]  ;;  %v350_v58 = vld [vmem:[#allocation5 + $0xa8] sm:$0xff]  ;;  %v1018_v61 = vpack.c.bf16 %v332_v53, %v331_v52 }
  0x66   :  { %v381_v59 = vld [vmem:[#allocation5 + $0x1a0] sm:$0xff]  ;;  %v382_v60 = vld [vmem:[#allocation5 + $0x1a8] sm:$0xff]  ;;  %v1050_v62 = vpack.c.bf16 %v364_v56, %v363_v54  ;;  %v1020_v63 = vpack.c.bf16 %v350_v58, %v349_v57  ;;  %v351_v6 = vld [vmem:[#allocation5 + $0xb0] sm:$0xff] }
  0x67   :  { %975 = vmatpush1.bf16.msra.mxu0 %v974_v24  ;;  %v333_v1 = vld [vmem:[#allocation5 + $0x20] sm:$0xff]  ;;  %v334_v2 = vld [vmem:[#allocation5 + $0x28] sm:$0xff]  ;;  %v1052_v4 = vpack.c.bf16 %v382_v60, %v381_v59  ;;  %v352_v7 = vld [vmem:[#allocation5 + $0xb8] sm:$0xff] }
  0x68   :  { %1007 = vmatpush1.bf16.msra.mxu1 %v1006_v25  ;;  %977 = vmatprep.subr.bf16.mxu0 %v976_v26  ;;  %v365_v3 = vld [vmem:[#allocation5 + $0x120] sm:$0xff]  ;;  %v366_v5 = vld [vmem:[#allocation5 + $0x128] sm:$0xff]  ;;  %v383_v8 = vld [vmem:[#allocation5 + $0x1b0] sm:$0xff]  ;;  %v1022_v10 = vpack.c.bf16 %v334_v2, %v333_v1  ;;  %v1024_v12 = vpack.c.bf16 %v352_v7, %v351_v6  ;;  %v155_v6 = vlaneseq }
  0x69   :  { %1009 = vmatprep.subr.bf16.mxu1 %v1008_v30  ;;  %v384_v9 = vld [vmem:[#allocation5 + $0x1b8] sm:$0xff]  ;;  %v1054_v11 = vpack.c.bf16 %v366_v5, %v365_v3  ;;  %v335_v13 = vld [vmem:[#allocation5 + $0x30] sm:$0xff]  ;;  %v353_v18 = vld [vmem:[#allocation5 + $0xc0] sm:$0xff]  ;;  %v1267_v5 = vmov 0.0|0.0  }
  0x6a   :  { %v336_v14 = vld [vmem:[#allocation5 + $0x38] sm:$0xff]  ;;  %v367_v15 = vld [vmem:[#allocation5 + $0x130] sm:$0xff]  ;;  %v1056_v16 = vpack.c.bf16 %v384_v9, %v383_v8  ;;  %v354_v19 = vld [vmem:[#allocation5 + $0xc8] sm:$0xff]  ;;  %v156_v7 = vshrl.u32 %v155_v6, 7 }
  0x6b   :  { %979 = vmatpush1.bf16.msra.mxu0 %v978_v36  ;;  %v368_v17 = vld [vmem:[#allocation5 + $0x138] sm:$0xff]  ;;  %v385_v20 = vld [vmem:[#allocation5 + $0x1c0] sm:$0xff]  ;;  %v386_v21 = vld [vmem:[#allocation5 + $0x1c8] sm:$0xff]  ;;  %v1026_v22 = vpack.c.bf16 %v336_v14, %v335_v13  ;;  %v1028_v24 = vpack.c.bf16 %v354_v19, %v353_v18 }
  0x6c   :  { %1011 = vmatpush1.bf16.msra.mxu1 %v1010_v37  ;;  %1013 = vmatprep.subr.bf16.mxu0 %v1012_v38  ;;  %v1058_v23 = vpack.c.bf16 %v368_v17, %v367_v15  ;;  %v337_v25 = vld [vmem:[#allocation5 + $0x40] sm:$0xff]  ;;  %v338_v26 = vld [vmem:[#allocation5 + $0x48] sm:$0xff]  ;;  %v1060_v28 = vpack.c.bf16 %v386_v21, %v385_v20  ;;  %v355_v30 = vld [vmem:[#allocation5 + $0xd0] sm:$0xff]  ;;  %v157_v8 = vsub.s32 0, %v156_v7 }
  0x6d   :  { %1045 = vmatprep.subr.bf16.mxu1 %v1044_v42  ;;  %v369_v27 = vld [vmem:[#allocation5 + $0x140] sm:$0xff]  ;;  %v370_v29 = vld [vmem:[#allocation5 + $0x148] sm:$0xff]  ;;  %v356_v31 = vld [vmem:[#allocation5 + $0xd8] sm:$0xff]  ;;  %v1030_v34 = vpack.c.bf16 %v338_v26, %v337_v25 }
  0x6e   :  { %240 = vmatmul.mubr.f32.vlgmr.msra.gmra.mrb[0].mxu0 %v152_v48  ;;  %v387_v32 = vld [vmem:[#allocation5 + $0x1d0] sm:$0xff]  ;;  %v388_v33 = vld [vmem:[#allocation5 + $0x1d8] sm:$0xff]  ;;  %v1062_v35 = vpack.c.bf16 %v370_v29, %v369_v27  ;;  %v1032_v36 = vpack.c.bf16 %v356_v31, %v355_v30  ;;  %v357_v44 = vld [vmem:[#allocation5 + $0xe0] sm:$0xff] }
  0x6f   :  { %311 = vmatmul.mubr.f32.vlgmr.msra.gmra.mrb[0].mxu1 %v152_v48  ;;  %1015 = vmatpush3.bf16.msra.mxu0 %v1014_v49  ;;  %v339_v37 = vld [vmem:[#allocation5 + $0x50] sm:$0xff]  ;;  %v340_v38 = vld [vmem:[#allocation5 + $0x58] sm:$0xff]  ;;  %v1064_v39 = vpack.c.bf16 %v388_v33, %v387_v32  ;;  %v358_v45 = vld [vmem:[#allocation5 + $0xe8] sm:$0xff] }
  0x70   :  { %1047 = vmatpush3.bf16.msra.mxu1 %v1046_v50  ;;  %1017 = vmatprep.subr.bf16.mxu0 %v1016_v51  ;;  %v371_v40 = vld [vmem:[#allocation5 + $0x150] sm:$0xff]  ;;  %v372_v41 = vld [vmem:[#allocation5 + $0x158] sm:$0xff]  ;;  %v1034_v42 = vpack.c.bf16 %v340_v38, %v339_v37  ;;  %v389_v46 = vld [vmem:[#allocation5 + $0x1e0] sm:$0xff]  ;;  %v1036_v47 = vpack.c.bf16 %v358_v45, %v357_v44 }
  0x71   :  { %1049 = vmatprep.subr.bf16.mxu1 %v1048_v55  ;;  %v1066_v43 = vpack.c.bf16 %v372_v41, %v371_v40  ;;  %v390_v48 = vld [vmem:[#allocation5 + $0x1e8] sm:$0xff]  ;;  %v341_v49 = vld [vmem:[#allocation5 + $0x60] sm:$0xff]  ;;  %v359_v56 = vld [vmem:[#allocation5 + $0xf0] sm:$0xff] }
  0x72   :  { %v342_v50 = vld [vmem:[#allocation5 + $0x68] sm:$0xff]  ;;  %v1068_v51 = vpack.c.bf16 %v390_v48, %v389_v46  ;;  %v373_v53 = vld [vmem:[#allocation5 + $0x160] sm:$0xff]  ;;  %v360_v57 = vld [vmem:[#allocation5 + $0xf8] sm:$0xff] }
  0x73   :  { %1019 = vmatpush3.bf16.msra.mxu0 %v1018_v61  ;;  %v1038_v52 = vpack.c.bf16 %v342_v50, %v341_v49  ;;  %v374_v54 = vld [vmem:[#allocation5 + $0x168] sm:$0xff]  ;;  %v391_v58 = vld [vmem:[#allocation5 + $0x1f0] sm:$0xff]  ;;  %v1040_v59 = vpack.c.bf16 %v360_v57, %v359_v56  ;;  %v392_v60 = vld [vmem:[#allocation5 + $0x1f8] sm:$0xff] }
  0x74   :  { %1051 = vmatpush3.bf16.msra.mxu1 %v1050_v62  ;;  %1021 = vmatprep.subr.bf16.mxu0 %v1020_v63  ;;  %v1070_v55 = vpack.c.bf16 %v374_v54, %v373_v53  ;;  %v343_v61 = vld [vmem:[#allocation5 + $0x70] sm:$0xff]  ;;  %v344_v62 = vld [vmem:[#allocation5 + $0x78] sm:$0xff]  ;;  %v1072_v63 = vpack.c.bf16 %v392_v60, %v391_v58  ;;  %v153_v9 = vld [vmem:[%s1433_s2] sm:$0xf] }
  0x75   :  { %1053 = vmatprep.subr.bf16.mxu1 %v1052_v4  ;;  %v1042_v1 = vpack.c.bf16 %v344_v62, %v343_v61  ;;  %v375_v2 = vld [vmem:[#allocation5 + $0x170] sm:$0xff]  ;;  %v376_v3 = vld [vmem:[#allocation5 + $0x178] sm:$0xff]  ;;  %v158_v13 = vrot.slane %v153_v9, %v157_v8  ;;  %v544_v25 = vld [vmem:[#allocation7 + $0x8] sm:$0xff] }
  0x76   :  { %v1074_v4 = vpack.c.bf16 %v376_v3, %v375_v2  ;;  %v545_v33 = vld [vmem:[#allocation7 + $0x10] sm:$0xff]  ;;  %v548_v40 = vld [vmem:[#allocation7 + $0x28] sm:$0xff]  ;;  %v551_v45 = vld [vmem:[#allocation7 + $0x40] sm:$0xff] }
  0x77   :  { %1023 = vmatpush3.bf16.msra.mxu0 %v1022_v10  ;;  %v165_v10 = vsub.s32 2, %v156_v7  ;;  %v552_v46 = vld [vmem:[#allocation7 + $0x48] sm:$0xff]  ;;  %v553_v48 = vld [vmem:[#allocation7 + $0x50] sm:$0xff]  ;;  %v554_v49 = vld [vmem:[#allocation7 + $0x58] sm:$0xff] }
  0x78   :  { %1055 = vmatpush3.bf16.msra.mxu1 %v1054_v11  ;;  %1025 = vmatprep.subr.bf16.mxu0 %v1024_v12  ;;  %v161_v11 = vsub.s32 1, %v156_v7  ;;  %v169_v12 = vsub.s32 3, %v156_v7  ;;  %v1092_v50 = vpack.c.bf16 %v554_v49, %v553_v48  ;;  %v557_v54 = vld [vmem:[#allocation7 + $0x70] sm:$0xff]  ;;  %v639_v57 = vld [vmem:[#allocation8] sm:$0xff]  ;;  %v640_v58 = vld [vmem:[#allocation8 + $0x8] sm:$0xff] }
  0x79   :  { %1057 = vmatprep.subr.bf16.mxu1 %v1056_v16  ;;  %v166_v14 = vrot.slane %v153_v9, %v165_v10  ;;  %v1101_v60 = vpack.c.bf16 %v640_v58, %v639_v57  ;;  %v642_v61 = vld [vmem:[#allocation8 + $0x18] sm:$0xff]  ;;  %v645_v3 = vld [vmem:[#allocation8 + $0x30] sm:$0xff]  ;;  %v648_v7 = vld [vmem:[#allocation8 + $0x48] sm:$0xff] }
  0x7a   :  { %v162_v15 = vrot.slane %v153_v9, %v161_v11  ;;  %v170_v16 = vrot.slane %v153_v9, %v169_v12  ;;  %v649_v9 = vld [vmem:[#allocation8 + $0x50] sm:$0xff]  ;;  %v650_v10 = vld [vmem:[#allocation8 + $0x58] sm:$0xff]  ;;  %v651_v12 = vld [vmem:[#allocation8 + $0x60] sm:$0xff] }
  0x7b   :  { %1027 = vmatpush3.bf16.msra.mxu0 %v1026_v22  ;;  %v1116_v11 = vpack.c.bf16 %v650_v10, %v649_v9 }
  0x7c   :  { %1059 = vmatpush3.bf16.msra.mxu1 %v1058_v23  ;;  %1029 = vmatprep.subr.bf16.mxu0 %v1028_v24  ;;  %v543_v24 = vld [vmem:[#allocation7] sm:$0xff] }
  0x7d   :  { %1061 = vmatprep.subr.bf16.mxu1 %v1060_v28  ;;  %v1077_v31 = vpack.c.bf16 %v544_v25, %v543_v24 }
  0x7f   :  { %1031 = vmatpush3.bf16.msra.mxu0 %v1030_v34  ;;  %v546_v34 = vld [vmem:[#allocation7 + $0x18] sm:$0xff] }
  0x80   :  { %1063 = vmatpush3.bf16.msra.mxu1 %v1062_v35  ;;  %1033 = vmatprep.subr.bf16.mxu0 %v1032_v36  ;;  %v1080_v38 = vpack.c.bf16 %v546_v34, %v545_v33  ;;  %v773_v34 = vld [vmem:[%s1439_s8] ss:$0 sm:$0xff] }
  0x81   :  { %1065 = vmatprep.subr.bf16.mxu1 %v1064_v39  ;;  %v547_v39 = vld [vmem:[#allocation7 + $0x20] sm:$0xff] }
  0x82   :  { %v1083_v41 = vpack.c.bf16 %v548_v40, %v547_v39 }
  0x83   :  { %1035 = vmatpush3.bf16.msra.mxu0 %v1034_v42  ;;  %v549_v42 = vld [vmem:[#allocation7 + $0x30] sm:$0xff] }
  0x84   :  { %1067 = vmatpush3.bf16.msra.mxu1 %v1066_v43  ;;  %1037 = vmatprep.subr.bf16.mxu0 %v1036_v47  ;;  %v550_v43 = vld [vmem:[#allocation7 + $0x38] sm:$0xff]  ;;  %v1089_v47 = vpack.c.bf16 %v552_v46, %v551_v45 }
  0x85   :  { %1069 = vmatprep.subr.bf16.mxu1 %v1068_v51  ;;  %v1086_v44 = vpack.c.bf16 %v550_v43, %v549_v42  ;;  %v555_v51 = vld [vmem:[#allocation7 + $0x60] sm:$0xff] }
  0x87   :  { %1039 = vmatpush3.bf16.msra.mxu0 %v1038_v52  ;;  %v556_v52 = vld [vmem:[#allocation7 + $0x68] sm:$0xff] }
  0x88   :  { %1071 = vmatpush3.bf16.msra.mxu1 %v1070_v55  ;;  %1041 = vmatprep.subr.bf16.mxu0 %v1040_v59  ;;  %v1095_v53 = vpack.c.bf16 %v556_v52, %v555_v51  ;;  %v558_v55 = vld [vmem:[#allocation7 + $0x78] sm:$0xff]  ;;  %v641_v59 = vld [vmem:[#allocation8 + $0x10] sm:$0xff] }
  0x89   :  { %1073 = vmatprep.subr.bf16.mxu1 %v1072_v63  ;;  %v1098_v56 = vpack.c.bf16 %v558_v55, %v557_v54  ;;  %v1104_v62 = vpack.c.bf16 %v642_v61, %v641_v59  ;;  %v643_v63 = vld [vmem:[#allocation8 + $0x20] sm:$0xff] }
  0x8b   :  { %1043 = vmatpush3.bf16.msra.mxu0 %v1042_v1  ;;  %v644_v1 = vld [vmem:[#allocation8 + $0x28] sm:$0xff] }
  0x8c   :  { %1075 = vmatpush3.bf16.msra.mxu1 %v1074_v4  ;;  %1076 = vmatprep.subr.bf16.mxu0 %v1267_v5  ;;  %v1107_v2 = vpack.c.bf16 %v644_v1, %v643_v63  ;;  %v646_v4 = vld [vmem:[#allocation8 + $0x38] sm:$0xff] }
  0x8d   :  { %1100 = vmatprep.subr.bf16.mxu1 %v1267_v5  ;;  %v1110_v6 = vpack.c.bf16 %v646_v4, %v645_v3 }
 0x141   :  { %v241_v17 = vpop.f32.mrb[0].mxu0 }
 0x142   :  { %v242_v18 = vadd.f32 %v241_v17, %v158_v13  ;;  %v312_v19 = vpop.f32.mrb[0].mxu1  ;;  %v243_v20 = vpop.f32.mrb[1].mxu0  ;;  %v652_v13 = vld [vmem:[#allocation8 + $0x68] sm:$0xff]  ;;  %v771_v17 = vld [vmem:[%s1435_s4] ss:$0 sm:$0xff] }
 0x143   :  { %v313_v21 = vadd.f32 %v312_v19, %v166_v14  ;;  %v244_v22 = vadd.f32 %v243_v20, %v162_v15  ;;  %v314_v23 = vpop.f32.mrb[1].mxu1  ;;  %v1119_v14 = vpack.c.bf16 %v652_v13, %v651_v12 }
 0x144   :  { %v321_v26 = vmul.f32 0.5, %v242_v18  ;;  %v315_v27 = vadd.f32 %v314_v23, %v170_v16  ;;  %vm317_vm0 = vcmp.ge.f32.partialorder %v242_v18, 0.0 }
 0x145   :  { %v323_v28 = vmul.f32 0.5, %v313_v21  ;;  %v322_v29 = vmul.f32 0.5, %v244_v22  ;;  %vm318_vm1 = vcmp.ge.f32.partialorder %v244_v22, 0.0  ;;  %vm319_vm2 = vcmp.ge.f32.partialorder %v313_v21, 0.0 }
 0x146   :  { %v324_v30 = vmul.f32 0.5, %v315_v27  ;;  %vm320_vm3 = vcmp.ge.f32.partialorder %v315_v27, 0.0  ;;  %v325_v36 = vsel %vm317_vm0, %v242_v18, %v321_v26  ;;  %v653_v26 = vld [vmem:[#allocation8 + $0x70] sm:$0xff] }
 0x147   :  { %v326_v32 = vsel %vm318_vm1, %v244_v22, %v322_v29  ;;  %v327_v37 = vsel %vm319_vm2, %v313_v21, %v323_v28 }
 0x148   :  { %464 = vmatprep.mubr.f32.mxu0 %v326_v32  ;;  %v328_v35 = vsel %vm320_vm3, %v315_v27, %v324_v30  ;;  %v654_v27 = vld [vmem:[#allocation8 + $0x78] sm:$0xff] }
 0x149   :  { %534 = vmatprep.mubr.f32.mxu1 %v328_v35  ;;  %465 = vmatmul.mubr.f32.vlgmr.msra.gmra.mrb[2].mxu0 %v325_v36  ;;  %v1122_v28 = vpack.c.bf16 %v654_v27, %v653_v26 }
 0x14a   :  { %535 = vmatmul.mubr.f32.vlgmr.msra.gmra.mrb[2].mxu1 %v327_v37  ;;  %1078 = vmatpush3.bf16.msra.mxu0 %v1077_v31 }
 0x14b   :  { %1079 = vmatprep.subr.bf16.mxu0 %v1267_v5  ;;  %910 = vmatprep.mubr.msk.f32.mxu0 %vm1268_vm4, %v1266_v0 }
 0x14c   :  { %945 = vmatprep.mubr.msk.f32.mxu1 %vm1268_vm4, %v1266_v0  ;;  %1102 = vmatpush3.bf16.msra.mxu1 %v1101_v60  ;;  %v647_v0 = vld [vmem:[#allocation8 + $0x40] sm:$0xff] }
 0x14d   :  { %1103 = vmatprep.subr.bf16.mxu1 %v1267_v5  ;;  %v1113_v8 = vpack.c.bf16 %v648_v7, %v647_v0 }
 0x14e   :  { %1081 = vmatpush3.bf16.msra.mxu0 %v1080_v38 }
 0x14f   :  { %1082 = vmatprep.subr.bf16.mxu0 %v1267_v5 }
 0x150   :  { %1105 = vmatpush3.bf16.msra.mxu1 %v1104_v62 }
 0x151   :  { %1106 = vmatprep.subr.bf16.mxu1 %v1267_v5 }
 0x152   :  { %1084 = vmatpush3.bf16.msra.mxu0 %v1083_v41 }
 0x153   :  { %1085 = vmatprep.subr.bf16.mxu0 %v1267_v5 }
 0x154   :  { %1108 = vmatpush3.bf16.msra.mxu1 %v1107_v2 }
 0x155   :  { %1109 = vmatprep.subr.bf16.mxu1 %v1267_v5 }
 0x156   :  { %1087 = vmatpush3.bf16.msra.mxu0 %v1086_v44 }
 0x157   :  { %1088 = vmatprep.subr.bf16.mxu0 %v1267_v5 }
 0x158   :  { %1111 = vmatpush3.bf16.msra.mxu1 %v1110_v6 }
 0x159   :  { %1112 = vmatprep.subr.bf16.mxu1 %v1267_v5 }
 0x15a   :  { %1090 = vmatpush3.bf16.msra.mxu0 %v1089_v47 }
 0x15b   :  { %1091 = vmatprep.subr.bf16.mxu0 %v1267_v5 }
 0x15c   :  { %1114 = vmatpush3.bf16.msra.mxu1 %v1113_v8 }
 0x15d   :  { %1115 = vmatprep.subr.bf16.mxu1 %v1267_v5 }
 0x15e   :  { %1093 = vmatpush3.bf16.msra.mxu0 %v1092_v50 }
 0x15f   :  { %1094 = vmatprep.subr.bf16.mxu0 %v1267_v5 }
 0x160   :  { %1117 = vmatpush3.bf16.msra.mxu1 %v1116_v11 }
 0x161   :  { %1118 = vmatprep.subr.bf16.mxu1 %v1267_v5 }
 0x162   :  { %1096 = vmatpush3.bf16.msra.mxu0 %v1095_v53 }
 0x163   :  { %1097 = vmatprep.subr.bf16.mxu0 %v1267_v5 }
 0x164   :  { %1120 = vmatpush3.bf16.msra.mxu1 %v1119_v14 }
 0x165   :  { %1121 = vmatprep.subr.bf16.mxu1 %v1267_v5  ;;  %v772_v5 = vld [vmem:[%s1437_s6] ss:$0 sm:$0xff]  ;;  %s1269_s6 = smov [#allocation10]  }
 0x166   :  { %1099 = vmatpush3.bf16.msra.mxu0 %v1098_v56  ;;  %s760_s8 = sshll.u32 %s1269_s6, 4  ;;  %s761_s8 = int_to_ptr.vmem [resolvable:$true] %s760_s8 }
 0x167   :  { %s1228_s23 = scalar_lea.vmem %s761_s8, 128  ;;  %p1233_p5 = scmp.lt.s32.totalorder %s761_s8, %s761_s8 }
 0x168   :  { %1123 = vmatpush3.bf16.msra.mxu1 %v1122_v28  ;;  %p1229_p4 = scmp.ne.s32.totalorder %s761_s8, %s1228_s23  ;;  %p1234_p6 = scmp.lt.s32.totalorder %s1228_s23, %s1228_s23 }
 0x16a   :  { %p1235_p7 = por %p1234_p6, %p1233_p5 }
 0x16c   :  { %p1236_p8 = pnand %p1235_p7, %p1229_p4 }
 0x21c   :  { %v806_v15 = vpop.f32.mrb[2].mxu0 }
 0x21d   :  { %v841_v16 = vpop.f32.mrb[2].mxu1  ;;  %v807_v18 = vpop.f32.mrb[3].mxu0 }
 0x21e   :  { %v808_v19 = vadd.f32 %v807_v18, %v806_v15  ;;  %v842_v20 = vpop.f32.mrb[3].mxu1 }
 0x21f   :  { %v843_v21 = vadd.f32 %v842_v20, %v841_v16 }
 0x220   :  { %v467_v22 = vadd.f32 %v808_v19, %v771_v17 }
 0x222   :  { %v537_v23 = vadd.f32 %v843_v21, %v467_v22 }
 0x224   :  { %v541_v24 = vmul.f32 0.5, %v537_v23  ;;  %vm540_vm5 = vcmp.ge.f32.partialorder %v537_v23, 0.0 }
 0x226   :  { %v542_v25 = vsel %vm540_vm5, %v537_v23, %v541_v24 }
 0x227   :  { %911 = vmatmul.mubr.f32.vlgmr.msra.gmra.mrb[4].mxu0 %v542_v25 }
 0x2fa   :  { %v632_v29 = vpop.f32.mrb[4].mxu0 }
 0x2fb   :  { %v633_v30 = vadd.f32 %v772_v5, %v632_v29  ;;  %v912_v31 = vpop.f32.mrb[5].mxu0 }
 0x2fd   :  { %vm636_vm6 = vcmp.ge.f32.partialorder %v633_v30, 0.0  ;;  %v637_v32 = vmul.f32 0.5, %v633_v30 }
 0x2ff   :  { %v638_v33 = vsel %vm636_vm6, %v633_v30, %v637_v32 }
 0x300   :  { %946 = vmatmul.mubr.f32.vlgmr.msra.gmra.mrb[4].mxu1 %v638_v33 }
 0x3d3   :  { %v728_v35 = vpop.f32.mrb[4].mxu1 }
 0x3d4   :  { %v729_v36 = vadd.f32 %v773_v34, %v728_v35  ;;  %v947_v37 = vpop.f32.mrb[5].mxu1 }
 0x3d6   :  { %v736_v38 = vrot.slane %v729_v36, 4 }
 0x3d8   :  { %v737_v39 = vmax.f32 %v729_v36, %v736_v38 }
 0x3da   :  { %v738_v40 = vrot.slane %v737_v39, 2 }
 0x3dc   :  { %v739_v41 = vmax.f32 %v737_v39, %v738_v40 }
 0x3de   :  { %v740_v42 = vrot.slane %v739_v41, 1 }
 0x3e0   :  { %v741_v43 = vmax.f32 %v739_v41, %v740_v42 }
 0x3e2   :  { %v742_v44 = vsub.f32 %v729_v36, %v741_v43 }
 0x3e4   :  { %v743_v45 = vmul.f32 1.442695, %v742_v44 }
 0x3e6   :  { %1136 = vpow2.f32 %v743_v45 }
 0x3f0   :  { %v1137_v46 = vpop.eup %1136 }
 0x3f1   :  { %v745_v47 = vrot.slane %v1137_v46, 4 }
 0x3f3   :  { %v746_v48 = vadd.f32 %v1137_v46, %v745_v47 }
 0x3f5   :  { %v747_v49 = vrot.slane %v746_v48, 2 }
 0x3f7   :  { %v748_v50 = vadd.f32 %v747_v49, %v746_v48 }
 0x3f9   :  { %v749_v51 = vrot.slane %v748_v50, 1 }
 0x3fb   :  { %v750_v52 = vadd.f32 %v749_v51, %v748_v50 }
 0x3fd   :  { %1138 = vrcp.f32 %v750_v52 }
 0x407   :  { %v1139_v53 = vpop.eup %1138 }
 0x408   :  { %v752_v54 = vmul.f32 %v1139_v53, %v1137_v46 }
 0x40a   :  { %753 = vst [vmem:[#allocation10] sm:$0xff] %v752_v54 }
 0x40b   :  { %1239 = shalt.err (!%p1236_p8)
}
 0x40c   :  { %s1240_s27 = scalar_lea.hbm %s1440_s9, 128 }
 0x40d   :  { %p1241_p9 = scmp.ne.s32.totalorder %s1440_s9, %s1240_s27  ;;  %p1244_p10 = scmp.lt.u32.totalorder %s1240_s27, %s1440_s9 }
 0x40f   :  { %p1246_p11 = pnand %p1244_p10, %p1241_p9 }
 0x411   :  { %1249 = shalt.err (!%p1246_p11)
}
 0x412   :  { %763 = dma.vmem_to_hbm [thread:$0]  %s761_s8, 128, %s1440_s9, [#allocation4]  }
 0x413   :  { %1256 = dma.done.wait [#allocation4], 128  }
 0x414   :  { %1257 = vsyncadd [#allocation4], 4294967168 }
 0x415   :  { %767 = vsyncpa [#allocation3], 1 }
 0x416   :  { %768 = vsyncpa [#allocation6], 1 }
 0x417   :  { %769 = vsyncpa [#allocation9], 1 }
 0x418   :  { %770 = vsyncpa [#allocation4], 1 }

</bundles_post_ra>
